<compile_context>
chip_gen: v5e
topology: v5e:2x2
jax: 0.10.0
libtpu: 0.0.40
codegen_flags: <defaults>
</compile_context>

<pallas_src>
import functools

import jax
import jax.numpy as jnp
from jax.experimental import pallas as pl
from jax.experimental.pallas import tpu as pltpu


def _round_up(x, m):
    return ((x + m - 1) // m) * m


def _choose_tile_n(n, d, itemsize):
    """Rows per grid step: largest multiple of 128 whose double-buffered data
    tiles stay within ~8 MiB, capped at 4096 to amortize the ~0.35 us/step
    overhead without blowing v7x's smaller VMEM."""
    budget = 8 * 1024 * 1024
    tn = budget // (2 * max(d, 1) * itemsize)
    tn = (tn // 128) * 128
    tn = int(max(128, min(4096, tn)))
    tn = min(tn, _round_up(n, 128))
    return tn


def _segment_small_kernel(seg_ref, data_ref, out_ref, *, mode):
    # Single-block fast path: whole problem lives in VMEM, one MXU dot.
    seg = seg_ref[...]                                    # (1, N) int32
    data = data_ref[...]                                  # (N, D)
    s = out_ref.shape[0]
    n = data.shape[0]
    row_ids = jax.lax.broadcasted_iota(jnp.int32, (s, n), 0)
    match = row_ids == seg                                # (S, N) bool
    one_hot = match.astype(data.dtype)
    result = jnp.dot(one_hot, data, preferred_element_type=jnp.float32)
    if mode == "mean":
        c = jnp.maximum(
            jnp.sum(match.astype(jnp.float32), axis=1, keepdims=True), 1.0)
        inv = pl.reciprocal(c, approx=True)               # EUP slot
        inv = inv * (2.0 - c * inv)                       # one Newton step
        result = result * inv
    out_ref[...] = result.astype(out_ref.dtype)


def _segment_tiled_kernel(seg_ref, data_ref, out_ref, *scratch,
                          mode, n_total, use_acc):
    # seg_ref : (num_tiles, tN) int32, resident for the whole grid (-1 = pad)
    # data_ref: (tN, D)          data tile (native dtype, D unpadded)
    # out_ref : (S_pad, D)       resident output block
    # scratch : [acc (S_pad, D) f32]  iff use_acc (non-f32 data)
    #           [cnt (S_pad, 1) f32]  iff mode == "mean"
    k = pl.program_id(0)
    tn = data_ref.shape[0]

    idx = 0
    if use_acc:
        acc_ref = scratch[idx]
        idx += 1
    else:
        acc_ref = out_ref            # f32: accumulate straight into the output
    cnt_ref = scratch[idx] if mode == "mean" else None

    @pl.when(k == 0)
    def _():
        acc_ref[...] = jnp.zeros_like(acc_ref)
        if mode == "mean":
            cnt_ref[...] = jnp.zeros_like(cnt_ref)

    seg = seg_ref[pl.ds(k, 1), :]                         # (1, tN)
    data = data_ref[...]                                  # (tN, D)

    # Ragged last tile: explicitly zero garbage rows (0 * NaN from the one-hot
    # would otherwise poison the accumulator).  Static no-op when tN | N.
    if n_total % tn != 0:
        row_idx = jax.lax.broadcasted_iota(jnp.int32, (tn, 1), 0) + k * tn
        data = jnp.where(row_idx < n_total, data, jnp.zeros_like(data))

    s_rows = acc_ref.shape[0]
    row_ids = jax.lax.broadcasted_iota(jnp.int32, (s_rows, tn), 0)
    match = row_ids == seg                                # (S_pad, tN) bool
    one_hot = match.astype(data.dtype)                    # cast right before MXU

    # Scatter-add as an MXU matmul with f32 accumulation.
    acc_ref[...] += jnp.dot(one_hot, data, preferred_element_type=jnp.float32)

    if mode == "mean":
        cnt_ref[...] += jnp.sum(match.astype(jnp.float32), axis=1, keepdims=True)

    if use_acc or mode == "mean":
        @pl.when(k == pl.num_programs(0) - 1)
        def _():
            result = acc_ref[...]
            if mode == "mean":
                c = jnp.maximum(cnt_ref[...], 1.0)        # torch count.clamp(min=1)
                inv = pl.reciprocal(c, approx=True)
                inv = inv * (2.0 - c * inv)               # Newton -> full f32
                result = result * inv
            out_ref[...] = result.astype(out_ref.dtype)


def unsorted_segment(data, segment_ids, num_segments, mode):
    """data: (N, D); segment_ids: (N,) int; returns (num_segments, D)."""
    if mode not in ("sum", "mean"):
        raise ValueError("Invalid parameter mode = '%s' !!" % mode)

    data = jnp.asarray(data)
    n, d = data.shape
    s = int(num_segments)
    seg_ids = jnp.asarray(segment_ids, dtype=jnp.int32)
    itemsize = jnp.dtype(data.dtype).itemsize

    # ---- Small-problem fast path: one VMEM block, exact shapes, no padding.
    if n <= 4096 and s <= 1024 and n * d * itemsize <= 512 * 1024:
        kernel = functools.partial(_segment_small_kernel, mode=mode)
        return pl.pallas_call(
            kernel,
            out_shape=jax.ShapeDtypeStruct((s, d), data.dtype),
            grid_spec=pltpu.PrefetchScalarGridSpec(
                num_scalar_prefetch=0,
                grid=(1,),
                in_specs=[
                    pl.BlockSpec((1, n), lambda i: (0, 0)),
                    pl.BlockSpec((n, d), lambda i: (0, 0)),
                ],
                out_specs=pl.BlockSpec((s, d), lambda i: (0, 0)),
            ),
            compiler_params=pltpu.CompilerParams(
                dimension_semantics=("arbitrary",),
            ),
        )(seg_ids.reshape(1, n), data)

    # ---- Tiled path: 1-D grid over N, data unpadded, resident accumulator.
    tn = _choose_tile_n(n, d, itemsize)
    num_tiles = (n + tn - 1) // tn
    n_pad = num_tiles * tn
    s_align = 8 if itemsize >= 4 else (16 if itemsize == 2 else 32)
    s_pad = _round_up(s, s_align)
    use_acc = data.dtype != jnp.float32

    # Only the tiny segment-id vector is padded; -1 never matches a segment.
    seg_p = (
        jnp.full((n_pad,), -1, dtype=jnp.int32)
        .at[:n].set(seg_ids)
        .reshape(num_tiles, tn)
    )

    scratch_shapes = []
    if use_acc:
        scratch_shapes.append(pltpu.VMEM((s_pad, d), jnp.float32))  # f32 sums
    if mode == "mean":
        scratch_shapes.append(pltpu.VMEM((s_pad, 1), jnp.float32))  # counts

    # Explicit scoped-VMEM budget: double-buffered data tiles + resident
    # seg ids / output / accumulator, with headroom.  Capped at 64 MiB so it
    # is valid on v7x; well above v5e's 16 MiB default scoped limit.
    est = (
        3 * tn * d * itemsize              # pipelined data tiles
        + 2 * n_pad * 4                    # resident segment-id block
        + 4 * s_pad * max(d, 128) * 4      # output block + f32 acc + counts
        + 2 * 1024 * 1024                  # headroom
    )
    vmem_limit = int(min(64 * 1024 * 1024, max(32 * 1024 * 1024, est)))

    kernel = functools.partial(
        _segment_tiled_kernel, mode=mode, n_total=n, use_acc=use_acc)

    out_p = pl.pallas_call(
        kernel,
        out_shape=jax.ShapeDtypeStruct((s_pad, d), data.dtype),
        grid_spec=pltpu.PrefetchScalarGridSpec(
            num_scalar_prefetch=0,
            grid=(num_tiles,),
            in_specs=[
                pl.BlockSpec((num_tiles, tn), lambda k: (0, 0)),  # resident ids
                pl.BlockSpec((tn, d), lambda k: (k, 0)),          # data tile
            ],
            out_specs=pl.BlockSpec((s_pad, d), lambda k: (0, 0)),
            scratch_shapes=scratch_shapes,
        ),
        compiler_params=pltpu.CompilerParams(
            dimension_semantics=("arbitrary",),                   # N = reduction
            vmem_limit_bytes=vmem_limit,
        ),
    )(seg_p, data)

    return out_p[:s, :]


class UnsortedSegmentExample:
    """JAX/Pallas port of the PyTorch UnsortedSegmentExample module."""

    def __init__(self, mode, segment_ids, num_segments):
        self.mode = mode
        self.segment_ids = jnp.asarray(segment_ids, dtype=jnp.int32)
        self.num_segments = int(num_segments[0])

    def __call__(self, data):
        return unsorted_segment(data, self.segment_ids, self.num_segments, self.mode)


def _reference(data, segment_ids, num_segments, mode):
    # Pure-JAX scatter-add mirroring the torch semantics (f32 accumulation).
    data_f32 = data.astype(jnp.float32)
    summed = jnp.zeros((num_segments, data.shape[1]), jnp.float32)
    summed = summed.at[segment_ids].add(data_f32)
    if mode == "mean":
        count = jnp.zeros((num_segments, data.shape[1]), jnp.float32)
        count = count.at[segment_ids].add(jnp.ones_like(data_f32))
        summed = summed / jnp.maximum(count, 1.0)
    return summed.astype(data.dtype)


if __name__ == "__main__":
    key = jax.random.PRNGKey(0)
    ok = True

    # (N, D, S, dtype, tol): the first case exercises the single-block fast
    # path (the module's shipped shape); the larger ones exercise the tiled
    # grid, the ragged-last-tile masking, and (bf16) the f32 scratch path.
    cases = [
        (8, 32, 4, jnp.float32, 1e-3),
        (6000, 64, 20, jnp.float32, 1e-3),
        (6000, 64, 20, jnp.bfloat16, 2e-2),
    ]

    for n, d, s, dtype, tol in cases:
        key, k_data, k_seg = jax.random.split(key, 3)
        data = jax.random.normal(k_data, (n, d), dtype=jnp.float32).astype(dtype)
        segment_ids = jax.random.randint(k_seg, (n,), 0, s, dtype=jnp.int32)
        num_segments_arr = jnp.array([s], dtype=jnp.int32)

        for mode in ("sum", "mean"):
            module = UnsortedSegmentExample(mode, segment_ids, num_segments_arr)
            out = jax.block_until_ready(module(data))
            ref = _reference(data, segment_ids, s, mode)
            good = out.shape == (s, d) and bool(
                jnp.allclose(out.astype(jnp.float32), ref.astype(jnp.float32),
                             atol=tol, rtol=tol))
            if not good:
                ok = False
                print("MISMATCH: n=%d d=%d s=%d dtype=%s mode=%s"
                      % (n, d, s, jnp.dtype(dtype).name, mode))

    if ok:
        print("KERNEL_OK")
</pallas_src>

<mosaic_0001>
module attributes {stable_mosaic.version = 11 : i64} {
  func.func @_segment_small_kernel(%arg0: i32, %arg1: memref<1x8xi32, #tpu.memory_space<vmem>>, %arg2: memref<8x32xf32, #tpu.memory_space<vmem>>, %arg3: memref<4x32xf32, #tpu.memory_space<vmem>>) attributes {dimension_semantics = [#tpu.dimension_semantics<arbitrary>], iteration_bounds = array<i64: 1>, scalar_prefetch = 0 : i64, scratch_operands = 0 : i64, tpu.core_type = #tpu.core_type<tc>, window_params = [{pipeline_mode = #tpu.pipeline_mode<synchronous>, transform_indices = @transform_0, window_bounds = array<i64: 1, 8>}, {pipeline_mode = #tpu.pipeline_mode<synchronous>, transform_indices = @transform_1, window_bounds = array<i64: 8, 32>}, {pipeline_mode = #tpu.pipeline_mode<synchronous>, transform_indices = @transform_2, window_bounds = array<i64: 4, 32>}]} {
    %c0 = arith.constant 0 : index
    %c0_0 = arith.constant 0 : index
    %0 = vector.load %arg1[%c0, %c0_0] : memref<1x8xi32, #tpu.memory_space<vmem>>, vector<1x8xi32>
    %c0_1 = arith.constant 0 : index
    %c0_2 = arith.constant 0 : index
    %1 = vector.load %arg2[%c0_1, %c0_2] : memref<8x32xf32, #tpu.memory_space<vmem>>, vector<8x32xf32>
    %2 = tpu.iota {dimensions = array<i32: 0>} : vector<4x8xi32>
    %3 = vector.broadcast %0 : vector<1x8xi32> to vector<4x8xi32>
    %4 = arith.cmpi eq, %2, %3 : vector<4x8xi32>
    %5 = arith.extui %4 : vector<4x8xi1> to vector<4x8xi32>
    %6 = arith.sitofp %5 : vector<4x8xi32> to vector<4x8xf32>
    %cst = arith.constant dense<0.000000e+00> : vector<4x32xf32>
    %7 = tpu.matmul %6, %1, %cst {dimension_numbers = #tpu.dot_dimension_numbers<[1], [0], [0], [1], [0, 0, 1, 1], [], []>} : vector<4x8xf32>, vector<8x32xf32>, vector<4x32xf32> -> vector<4x32xf32>
    %c0_3 = arith.constant 0 : index
    %c0_4 = arith.constant 0 : index
    %8 = vector.load %arg3[%c0_3, %c0_4] : memref<4x32xf32, #tpu.memory_space<vmem>>, vector<4x32xf32>
    tpu.vector_store %arg3[%c0_3, %c0_4], %7 {strides = array<i32>} : memref<4x32xf32, #tpu.memory_space<vmem>>, vector<4x32xf32>,
    return
  }
  func.func @transform_0(%arg0: i32) -> (i32, i32) {
    %c0_i32 = arith.constant 0 : i32
    %c0_i32_0 = arith.constant 0 : i32
    %c0_i32_1 = arith.constant 0 : i32
    return %c0_i32, %c0_i32_0 : i32, i32
  }
  func.func @transform_1(%arg0: i32) -> (i32, i32) {
    %c0_i32 = arith.constant 0 : i32
    %c0_i32_0 = arith.constant 0 : i32
    %c0_i32_1 = arith.constant 0 : i32
    return %c0_i32, %c0_i32_0 : i32, i32
  }
  func.func @transform_2(%arg0: i32) -> (i32, i32) {
    %c0_i32 = arith.constant 0 : i32
    %c0_i32_0 = arith.constant 0 : i32
    %c0_i32_1 = arith.constant 0 : i32
    return %c0_i32, %c0_i32_0 : i32, i32
  }
}

</mosaic_0001>

<bundles_post_ra>
// kernel: tpu_custom_call.1
= control target key start
LH: loop header
LB: loop body
LE: loop exit
PB: predicated region body
PF: predicated region fallthrough
CT: control target
= control target key end

     0   :  { %7 = vsyncpa [#allocation3], 0  ;;  %s205_s0 = inlined_call_operand.hbm [shape: s32[1,8], index: 0, kind: input, shape index: {}]   ;;  %s206_s1 = inlined_call_operand.hbm [shape: f32[8,32], index: 1, kind: input, shape index: {}]   ;;  %s207_s2 = inlined_call_operand.hbm [shape: f32[4,32], index: 2, kind: output, shape index: {}]  }
   0x1   :  { %8 = vsyncpa [#allocation6], 0 }
   0x2   :  { %9 = vsyncpa [#allocation4], 0  ;;  %s15_s11 = sshll.u32 %s205_s0, 4  ;;  %s177_s12 = smov [#allocation2]   ;;  %s16_s11 = int_to_ptr.hbm [resolvable:$true] %s15_s11 }
   0x3   :  { %s17_s13 = sshll.u32 %s177_s12, 4  ;;  %s26_s16 = sshll.u32 %s206_s1, 4  ;;  %s18_s13 = int_to_ptr.vmem [resolvable:$true] %s17_s13  ;;  %s27_s16 = int_to_ptr.hbm [resolvable:$true] %s26_s16 }
   0x4   :  { %20 = dma.hbm_to_vmem [thread:$0]  %s16_s11, 16, %s18_s13, [#allocation3]  }
   0x5   :  { %s178_s17 = smov [#allocation5]  }
   0x6   :  { %s28_s18 = sshll.u32 %s178_s17, 4  ;;  %s29_s18 = int_to_ptr.vmem [resolvable:$true] %s28_s18 }
   0x7   :  { %31 = dma.hbm_to_vmem [thread:$0]  %s27_s16, 128, %s29_s18, [#allocation6]  }
   0x8   :  { %171 = dma.done.wait [#allocation3], 16  }
   0x9   :  { %172 = vsyncadd [#allocation3], 4294967280 }
   0xa   :  { %173 = dma.done.wait [#allocation6], 128  }
   0xb   :  { %174 = vsyncadd [#allocation6], 4294967168  ;;  %v42_v0 = vlaneseq  ;;  %v41_v2 = vld [vmem:[#allocation5] sm:$0xff]  ;;  %v98_v3 = vld [vmem:[#allocation2] ss:$0 sm:$0xff]  ;;  %vm48_vm0 = vcmask 64512  }
   0xc   :  { %67 = vmatpush.msra.mxu0 %v41_v2  ;;  %v179_v4 = vmov 0.0   ;;  %s180_s0 = smov [#allocation7]   ;;  %s81_s21 = sshll.u32 %s207_s2, 4  ;;  %vm72_vm2 = vcmask 257024   ;;  %s82_s21 = int_to_ptr.hbm [resolvable:$true] %s81_s21 }
   0xd   :  { %v43_v1 = vshrl.u32 %v42_v0, 7  ;;  %s79_s1 = sshll.u32 %s180_s0, 4  ;;  %s80_s1 = int_to_ptr.vmem [resolvable:$true] %s79_s1 }
   0xf   :  { %vm45_vm1 = vcmp.eq.s32.totalorder %v43_v1, %v98_v3 }
  0x10   :  { %v92_v5 = vsel %vm45_vm1, 1.0, %v179_v4 }
  0x11   :  { %93 = vmatmul.msk.f32.vlgmr.msra.gmra.mxu0 %vm48_vm0, %v92_v5 }
  0x8e   :  { %v69_v6 = vpop.f32.mrf.mxu0 }
  0x8f   :  { %73 = vst.msk [vmem:[#allocation7] sm:$0xf] %vm72_vm2, %v69_v6 }
  0x90   :  { %84 = dma.vmem_to_hbm [thread:$0]  %s80_s1, 64, %s82_s21, [#allocation4]  }
  0x91   :  { %175 = dma.done.wait [#allocation4], 64  }
  0x92   :  { %176 = vsyncadd [#allocation4], 4294967232 }
  0x93   :  { %89 = vsyncpa [#allocation3], 1 }
  0x94   :  { %90 = vsyncpa [#allocation6], 1 }
  0x95   :  { %91 = vsyncpa [#allocation4], 1 }

</bundles_post_ra>
